<compile_context>
chip_gen: v6e
topology: v6e:2x2x1
jax: 0.10.0
libtpu: 0.0.40
codegen_flags: <defaults>
</compile_context>

<pallas_src>
import functools

import jax
import jax.numpy as jnp
from jax import lax
from jax.experimental import pallas as pl
from jax.experimental.pallas import tpu as pltpu


# ----------------------------- Pallas kernel ------------------------------- #

def hyperconn_fused_kernel(res_ref, wa_ref, wb_ref, sa0_ref, sb_ref, scales_ref,
                           branch_ref, out_ref, *, d_chunk):
    """Fused width + depth connection for one (batch-fold, lane-tile) block.

    res_ref    : (TB, S, D, TP)  residual streams (I/O dtype)
    wa_ref     : (D, 1) f32      row 0 of dynamic_alpha_fn weight, pre-scaled by sqrt(D)*(gamma+1)
    wb_ref     : (D, 1) f32      dynamic_beta_fn weight, pre-scaled by sqrt(D)*(gamma+1)
    sa0_ref    : (S, 1) f32      static_alpha[:, 0]
    sb_ref     : (S, 1) f32      static_beta
    scales_ref : (2,)  f32 SMEM  [dynamic_alpha_scale, dynamic_beta_scale]
    branch_ref : (TB, D, TP)     output: branch input (mix_h[:, 0])
    out_ref    : (TB, S, D, TP)  output: residuals + beta * branch_out (identity branch)
    """
    TB, S, D, TP = res_ref.shape
    f32 = jnp.float32

    sa0 = sa0_ref[...].astype(f32)            # (S, 1)
    sb = sb_ref[...].astype(f32)              # (S, 1)
    a_scale = scales_ref[0]
    b_scale = scales_ref[1]

    for tb in range(TB):                      # static unroll over folded batch elements
        # ---- pass 1: single chunked sweep over D, three fused reductions per load ----
        sumsq = jnp.zeros((S, TP), f32)
        a0 = jnp.zeros((S, TP), f32)
        b0 = jnp.zeros((S, TP), f32)
        for c0 in range(0, D, d_chunk):
            dc = min(d_chunk, D - c0)
            xc = res_ref[tb, :, c0:c0 + dc, :].astype(f32)       # (S, dc, TP)
            wac = wa_ref[c0:c0 + dc, :]                          # (dc, 1)
            wbc = wb_ref[c0:c0 + dc, :]                          # (dc, 1)
            sumsq = sumsq + jnp.sum(xc * xc, axis=1)             # (S, TP)
            a0 = a0 + jnp.sum(xc * wac, axis=1)
            b0 = b0 + jnp.sum(xc * wbc, axis=1)

        # RMSNorm folded into the 1x1 convs:
        #   sum_d normed_d * w_d == (sum_d x_d * w_eff_d) * rsqrt(sum_d x_d^2)
        inv_l2 = lax.rsqrt(jnp.maximum(sumsq, 1e-24))            # == 1 / max(||x||, 1e-12)
        alpha0 = jnp.tanh(a0 * inv_l2) * a_scale + sa0           # (S, TP)
        beta = jnp.tanh(b0 * inv_l2) * b_scale + sb              # (S, TP)

        # ---- pass 2: width (mix_h[:, 0]) + depth connection, chunked over D ----
        for c0 in range(0, D, d_chunk):
            dc = min(d_chunk, D - c0)
            xc = res_ref[tb, :, c0:c0 + dc, :].astype(f32)       # (S, dc, TP)
            br = jnp.sum(alpha0[:, None, :] * xc, axis=0)        # (dc, TP)
            branch_ref[tb, c0:c0 + dc, :] = br.astype(branch_ref.dtype)
            # depth connection with identity branch:
            #   out[s, d, p] = residuals[s, d, p] + branch_out[d, p] * beta[s, p]
            out_ref[tb, :, c0:c0 + dc, :] = (
                xc + br[None, :, :] * beta[:, None, :]).astype(out_ref.dtype)
    # TODO(synk): dropout with p > 0 would require pltpu.prng_*; reference uses p = 0.0.


# --------------------------- VMEM-aware tiling ------------------------------ #

def _vmem_limit_bytes():
    """Explicit scoped-VMEM limit derived from the physical VMEM, with headroom."""
    phys = None
    try:
        info = pltpu.get_tpu_info()
        phys = int(getattr(info, "vmem_capacity_bytes", 0)) or None
    except Exception:
        phys = None
    if phys is None:
        phys = 64 * 1024 * 1024          # conservative fallback (v7x per-TC VMEM)
    return min(int(phys * 0.75), 100 * 1024 * 1024)


def _choose_tiles(B, S, D, P, io_itemsize):
    """Pick (TB, TP, Ppad, d_chunk, vmem_limit) so double-buffered blocks fit VMEM,
    lane tiles are 128-aligned, and the grid has >=2 steps whenever possible."""
    vmem_limit = _vmem_limit_bytes()
    block_budget = int(vmem_limit * 0.55)    # headroom for f32 temporaries / spills
    d_chunk = min(D, 32)

    def step_bytes(tb, tp):
        blocks = tb * tp * (2 * S * D + D) * io_itemsize          # in + out + branch tiles
        temps = tb * S * tp * (3 * d_chunk + 10) * 4              # f32 chunk temps + accums
        return 2 * blocks + temps                                  # double-buffered pipeline

    # largest 128-multiple lane tile that fits the budget (capped by padded P)
    tp_cap = ((max(P, 1) + 127) // 128) * 128
    tp = tp_cap
    while tp > 128 and step_bytes(1, tp) > block_budget:
        tp -= 128
    TP = max(tp, 128)

    Ppad = ((P + TP - 1) // TP) * TP
    n_ptiles = Ppad // TP

    # guarantee >=2 grid steps so v7x's two TensorCores both get work
    if B * n_ptiles == 1 and TP >= 256:
        TP = max(128, (TP // 2) // 128 * 128)
        Ppad = ((P + TP - 1) // TP) * TP
        n_ptiles = Ppad // TP

    # fold small batches into one block until each step streams ~2 MiB,
    # keeping at least 2 total grid steps when that is achievable
    TB = 1
    target = 2 * 1024 * 1024
    while TB * TP * (2 * S * D + D) * io_itemsize < target:
        nxt = None
        for cand in range(TB + 1, B + 1):
            if B % cand == 0:
                nxt = cand
                break
        if nxt is None:
            break
        if step_bytes(nxt, TP) > block_budget:
            break
        if (B // nxt) * n_ptiles < 2 and B * n_ptiles >= 2:
            break
        TB = nxt

    return TB, TP, Ppad, d_chunk, vmem_limit


# ------------------------------ JAX wrapper -------------------------------- #

def hyper_connections_pallas(residuals_nchw, params, num_residual_streams, io_dtype=None):
    """residuals_nchw: (B*S, D, H, W).  Returns (branch_input, new_residuals)."""
    S = num_residual_streams
    N, D, H, W = residuals_nchw.shape
    assert N % S == 0
    B = N // S
    P = H * W

    io_dtype = jnp.dtype(io_dtype) if io_dtype is not None else residuals_nchw.dtype
    x = residuals_nchw.reshape(B, S, D, P).astype(io_dtype)

    # Fold sqrt(D)*(gamma+1) into the 1x1-conv weights (exact algebra, f32 params).
    gamma_eff = (params["gamma"].reshape(D).astype(jnp.float32) + 1.0) * (float(D) ** 0.5)
    wa_eff = (params["w_alpha"][0].astype(jnp.float32) * gamma_eff).reshape(D, 1)   # alpha row 0
    wb_eff = (params["w_beta"][0].astype(jnp.float32) * gamma_eff).reshape(D, 1)
    sa0_b = params["static_alpha"][:, 0].astype(jnp.float32).reshape(S, 1)
    sb_b = params["static_beta"].astype(jnp.float32).reshape(S, 1)
    scales = jnp.array([params["alpha_scale"], params["beta_scale"]], dtype=jnp.float32)

    TB, TP, Ppad, d_chunk, vmem_limit = _choose_tiles(B, S, D, P, io_dtype.itemsize)
    if Ppad != P:
        x = jnp.pad(x, ((0, 0), (0, 0), (0, 0), (0, Ppad - P)))
    n_ptiles = Ppad // TP
    grid = (B // TB, n_ptiles)

    kernel = functools.partial(hyperconn_fused_kernel, d_chunk=d_chunk)

    branch_p, out_p = pl.pallas_call(
        kernel,
        out_shape=(jax.ShapeDtypeStruct((B, D, Ppad), io_dtype),
                   jax.ShapeDtypeStruct((B, S, D, Ppad), io_dtype)),
        grid=grid,
        in_specs=[
            pl.BlockSpec((TB, S, D, TP), lambda b, p: (b, 0, 0, p)),
            pl.BlockSpec((D, 1), lambda b, p: (0, 0)),
            pl.BlockSpec((D, 1), lambda b, p: (0, 0)),
            pl.BlockSpec((S, 1), lambda b, p: (0, 0)),
            pl.BlockSpec((S, 1), lambda b, p: (0, 0)),
            pl.BlockSpec(memory_space=pltpu.MemorySpace.SMEM),
        ],
        out_specs=(pl.BlockSpec((TB, D, TP), lambda b, p: (b, 0, p)),
                   pl.BlockSpec((TB, S, D, TP), lambda b, p: (b, 0, 0, p))),
        # residual input HBM buffer is reused as the residual output (same block maps,
        # read-before-write per tile) -> donation, no second (B,S,D,P) allocation.
        input_output_aliases={0: 1},
        compiler_params=pltpu.CompilerParams(
            dimension_semantics=("parallel", "parallel"),
            vmem_limit_bytes=vmem_limit),
    )(x, wa_eff, wb_eff, sa0_b, sb_b, scales)

    branch_input = branch_p[..., :P].reshape(B, D, H, W)
    out = out_p[..., :P].reshape(B * S, D, H, W)
    return branch_input, out


# ------------------------ pure-JAX reference (check) ------------------------ #

def hyper_connections_reference(residuals, params, S):
    N, D, H, W = residuals.shape
    B = N // S
    x = residuals.astype(jnp.float32)

    l2 = jnp.sqrt(jnp.sum(x * x, axis=1, keepdims=True))
    normed = x / jnp.maximum(l2, 1e-12) * (float(D) ** 0.5) * (
        params["gamma"].reshape(1, D, 1, 1) + 1.0)

    wc = jnp.tanh(jnp.einsum("td,ndhw->nthw", params["w_alpha"], normed))
    dyn_alpha = (wc * params["alpha_scale"]).reshape(B, S, S + 1, H, W)
    alpha = dyn_alpha + params["static_alpha"][None, :, :, None, None]

    dc = jnp.tanh(jnp.einsum("d,ndhw->nhw", params["w_beta"][0], normed))
    dyn_beta = (dc * params["beta_scale"]).reshape(B, S, H, W)
    beta = dyn_beta + params["static_beta"][None, :, None, None]

    res_bs = x.reshape(B, S, D, H, W)
    mix_h = jnp.einsum("bsthw,bsdhw->btdhw", alpha, res_bs)
    branch_input = mix_h[:, 0]
    # mix_h[:, 1:] is discarded by the reference; residuals passed on are the (identity-
    # transformed) originals.
    branch_output = branch_input  # identity branch
    output = jnp.einsum("bdhw,bshw->bsdhw", branch_output, beta).reshape(B * S, D, H, W)
    return branch_input, x + output


# ---------------------------------- main ----------------------------------- #

if __name__ == "__main__":
    B, S, D, H, W = 2, 4, 32, 16, 16      # num_residual_streams = 4, dim = 32
    key = jax.random.PRNGKey(0)
    k_x, k_wa, k_wb, k_g = jax.random.split(key, 4)

    residuals = jax.random.normal(k_x, (B * S, D, H, W), dtype=jnp.float32)

    layer_index = 0                        # deterministic (reference uses randrange if None)
    init_alpha0 = jnp.zeros((S, 1), jnp.float32).at[layer_index % S, 0].set(1.0)
    params = dict(
        gamma=0.1 * jax.random.normal(k_g, (D,), dtype=jnp.float32),      # RMSNorm.gamma
        w_alpha=0.05 * jax.random.normal(k_wa, (S + 1, D), dtype=jnp.float32),
        w_beta=0.05 * jax.random.normal(k_wb, (1, D), dtype=jnp.float32),
        static_alpha=jnp.concatenate([init_alpha0, jnp.eye(S, dtype=jnp.float32)], axis=1),
        static_beta=jnp.ones((S,), jnp.float32),
        alpha_scale=jnp.float32(0.01),
        beta_scale=jnp.float32(0.01),
    )

    # f32 I/O path (exact-tolerance check against the pure-JAX reference)
    fwd = jax.jit(functools.partial(hyper_connections_pallas, num_residual_streams=S))
    branch_in, out = fwd(residuals, params)
    jax.block_until_ready((branch_in, out))

    ref_branch_in, ref_out = hyper_connections_reference(residuals, params, S)

    assert branch_in.shape == (B, D, H, W) and out.shape == (B * S, D, H, W)
    assert jnp.allclose(branch_in, ref_branch_in, atol=1e-5, rtol=1e-5), "branch_input mismatch"
    assert jnp.allclose(out, ref_out, atol=1e-5, rtol=1e-5), "residual output mismatch"

    # bf16 I/O smoke test (f32 math inside; halves HBM traffic on the streaming path)
    fwd_bf16 = jax.jit(functools.partial(
        hyper_connections_pallas, num_residual_streams=S, io_dtype=jnp.bfloat16))
    b16_branch, b16_out = fwd_bf16(residuals, params)
    jax.block_until_ready((b16_branch, b16_out))
    assert b16_branch.dtype == jnp.bfloat16 and b16_out.dtype == jnp.bfloat16
    assert bool(jnp.isfinite(b16_out.astype(jnp.float32)).all())
    assert bool(jnp.isfinite(b16_branch.astype(jnp.float32)).all())

    print("KERNEL_OK")
</pallas_src>

<mosaic_0001>
module attributes {stable_mosaic.version = 11 : i64} {
  func.func @hyperconn_fused_kernel(%arg0: i32, %arg1: i32, %arg2: memref<1x4x32x256xf32, #tpu.memory_space<vmem>>, %arg3: memref<32x1xf32, #tpu.memory_space<vmem>>, %arg4: memref<32x1xf32, #tpu.memory_space<vmem>>, %arg5: memref<4x1xf32, #tpu.memory_space<vmem>>, %arg6: memref<4x1xf32, #tpu.memory_space<vmem>>, %arg7: memref<2xf32, #tpu.memory_space<smem>>, %arg8: memref<1x32x256xf32, #tpu.memory_space<vmem>>, %arg9: memref<1x4x32x256xf32, #tpu.memory_space<vmem>>) attributes {dimension_semantics = [#tpu.dimension_semantics<parallel>, #tpu.dimension_semantics<parallel>], iteration_bounds = array<i64: 2, 1>, scalar_prefetch = 0 : i64, scratch_operands = 0 : i64, tpu.core_type = #tpu.core_type<tc>, window_params = [{transform_indices = @transform_0, window_bounds = array<i64: 1, 4, 32, 256>}, {pipeline_mode = #tpu.pipeline_mode<synchronous>, transform_indices = @transform_1, window_bounds = array<i64: 32, 1>}, {pipeline_mode = #tpu.pipeline_mode<synchronous>, transform_indices = @transform_2, window_bounds = array<i64: 32, 1>}, {pipeline_mode = #tpu.pipeline_mode<synchronous>, transform_indices = @transform_3, window_bounds = array<i64: 4, 1>}, {pipeline_mode = #tpu.pipeline_mode<synchronous>, transform_indices = @transform_4, window_bounds = array<i64: 4, 1>}, {transform_indices = @transform_5, window_bounds = array<i64: 2>}, {transform_indices = @transform_6, window_bounds = array<i64: 1, 32, 256>}, {transform_indices = @transform_7, window_bounds = array<i64: 1, 4, 32, 256>}]} {
    %c0 = arith.constant 0 : index
    %c0_0 = arith.constant 0 : index
    %0 = vector.load %arg5[%c0, %c0_0] : memref<4x1xf32, #tpu.memory_space<vmem>>, vector<4x1xf32>
    %c0_1 = arith.constant 0 : index
    %c0_2 = arith.constant 0 : index
    %1 = vector.load %arg6[%c0_1, %c0_2] : memref<4x1xf32, #tpu.memory_space<vmem>>, vector<4x1xf32>
    %c0_3 = arith.constant 0 : index
    %2 = memref.load %arg7[%c0_3] : memref<2xf32, #tpu.memory_space<smem>>
    %c1 = arith.constant 1 : index
    %3 = memref.load %arg7[%c1] : memref<2xf32, #tpu.memory_space<smem>>
    %cst = arith.constant 0.000000e+00 : f32
    %4 = vector.broadcast %cst : f32 to vector<4x256xf32>
    %cst_4 = arith.constant 0.000000e+00 : f32
    %5 = vector.broadcast %cst_4 : f32 to vector<4x256xf32>
    %cst_5 = arith.constant 0.000000e+00 : f32
    %6 = vector.broadcast %cst_5 : f32 to vector<4x256xf32>
    %c0_6 = arith.constant 0 : index
    %c0_7 = arith.constant 0 : index
    %c0_8 = arith.constant 0 : index
    %c0_9 = arith.constant 0 : index
    %7 = vector.load %arg2[%c0_6, %c0_7, %c0_8, %c0_9] : memref<1x4x32x256xf32, #tpu.memory_space<vmem>>, vector<1x4x32x256xf32>
    %8 = vector.shape_cast %7 : vector<1x4x32x256xf32> to vector<4x32x256xf32>
    %c0_10 = arith.constant 0 : index
    %c0_11 = arith.constant 0 : index
    %9 = vector.load %arg3[%c0_10, %c0_11] : memref<32x1xf32, #tpu.memory_space<vmem>>, vector<32x1xf32>
    %c0_12 = arith.constant 0 : index
    %c0_13 = arith.constant 0 : index
    %10 = vector.load %arg4[%c0_12, %c0_13] : memref<32x1xf32, #tpu.memory_space<vmem>>, vector<32x1xf32>
    %11 = arith.mulf %8, %8 : vector<4x32x256xf32>
    %cst_14 = arith.constant dense<0.000000e+00> : vector<4x256xf32>
    %12 = vector.multi_reduction <add>, %11, %cst_14 [1] : vector<4x32x256xf32> to vector<4x256xf32>
    %13 = arith.addf %4, %12 : vector<4x256xf32>
    %14 = vector.shape_cast %9 : vector<32x1xf32> to vector<1x32x1xf32>
    %15 = vector.broadcast %14 : vector<1x32x1xf32> to vector<4x32x256xf32>
    %16 = arith.mulf %8, %15 : vector<4x32x256xf32>
    %cst_15 = arith.constant dense<0.000000e+00> : vector<4x256xf32>
    %17 = vector.multi_reduction <add>, %16, %cst_15 [1] : vector<4x32x256xf32> to vector<4x256xf32>
    %18 = arith.addf %5, %17 : vector<4x256xf32>
    %19 = vector.shape_cast %10 : vector<32x1xf32> to vector<1x32x1xf32>
    %20 = vector.broadcast %19 : vector<1x32x1xf32> to vector<4x32x256xf32>
    %21 = arith.mulf %8, %20 : vector<4x32x256xf32>
    %cst_16 = arith.constant dense<0.000000e+00> : vector<4x256xf32>
    %22 = vector.multi_reduction <add>, %21, %cst_16 [1] : vector<4x32x256xf32> to vector<4x256xf32>
    %23 = arith.addf %6, %22 : vector<4x256xf32>
    %cst_17 = arith.constant 1.000000e-24 : f32
    %24 = vector.broadcast %cst_17 : f32 to vector<4x256xf32>
    %25 = arith.maximumf %13, %24 : vector<4x256xf32>
    %26 = math.rsqrt %25 : vector<4x256xf32>
    %27 = arith.mulf %18, %26 : vector<4x256xf32>
    %28 = math.tanh %27 : vector<4x256xf32>
    %29 = vector.broadcast %2 : f32 to vector<4x256xf32>
    %30 = arith.mulf %28, %29 : vector<4x256xf32>
    %31 = vector.broadcast %0 : vector<4x1xf32> to vector<4x256xf32>
    %32 = arith.addf %30, %31 : vector<4x256xf32>
    %33 = arith.mulf %23, %26 : vector<4x256xf32>
    %34 = math.tanh %33 : vector<4x256xf32>
    %35 = vector.broadcast %3 : f32 to vector<4x256xf32>
    %36 = arith.mulf %34, %35 : vector<4x256xf32>
    %37 = vector.broadcast %1 : vector<4x1xf32> to vector<4x256xf32>
    %38 = arith.addf %36, %37 : vector<4x256xf32>
    %c0_18 = arith.constant 0 : index
    %c0_19 = arith.constant 0 : index
    %c0_20 = arith.constant 0 : index
    %c0_21 = arith.constant 0 : index
    %39 = vector.load %arg2[%c0_18, %c0_19, %c0_20, %c0_21] : memref<1x4x32x256xf32, #tpu.memory_space<vmem>>, vector<1x4x32x256xf32>
    %40 = vector.shape_cast %39 : vector<1x4x32x256xf32> to vector<4x32x256xf32>
    %41 = vector.shape_cast %32 : vector<4x256xf32> to vector<4x1x256xf32>
    %42 = vector.broadcast %41 : vector<4x1x256xf32> to vector<4x32x256xf32>
    %43 = arith.mulf %42, %40 : vector<4x32x256xf32>
    %cst_22 = arith.constant dense<0.000000e+00> : vector<32x256xf32>
    %44 = vector.multi_reduction <add>, %43, %cst_22 [0] : vector<4x32x256xf32> to vector<32x256xf32>
    %c0_23 = arith.constant 0 : index
    %c0_24 = arith.constant 0 : index
    %c0_25 = arith.constant 0 : index
    %45 = vector.load %arg8[%c0_23, %c0_24, %c0_25] : memref<1x32x256xf32, #tpu.memory_space<vmem>>, vector<1x32x256xf32>
    %46 = vector.shape_cast %45 : vector<1x32x256xf32> to vector<32x256xf32>
    %47 = vector.shape_cast %44 : vector<32x256xf32> to vector<1x32x256xf32>
    tpu.vector_store %arg8[%c0_23, %c0_24, %c0_25], %47 {strides = array<i32>} : memref<1x32x256xf32, #tpu.memory_space<vmem>>, vector<1x32x256xf32>,
    %48 = vector.shape_cast %44 : vector<32x256xf32> to vector<1x32x256xf32>
    %49 = vector.shape_cast %38 : vector<4x256xf32> to vector<4x1x256xf32>
    %50 = vector.broadcast %48 : vector<1x32x256xf32> to vector<4x32x256xf32>
    %51 = vector.broadcast %49 : vector<4x1x256xf32> to vector<4x32x256xf32>
    %52 = arith.mulf %50, %51 : vector<4x32x256xf32>
    %53 = arith.addf %40, %52 : vector<4x32x256xf32>
    %c0_26 = arith.constant 0 : index
    %c0_27 = arith.constant 0 : index
    %c0_28 = arith.constant 0 : index
    %c0_29 = arith.constant 0 : index
    %54 = vector.load %arg9[%c0_26, %c0_27, %c0_28, %c0_29] : memref<1x4x32x256xf32, #tpu.memory_space<vmem>>, vector<1x4x32x256xf32>
    %55 = vector.shape_cast %54 : vector<1x4x32x256xf32> to vector<4x32x256xf32>
    %56 = vector.shape_cast %53 : vector<4x32x256xf32> to vector<1x4x32x256xf32>
    tpu.vector_store %arg9[%c0_26, %c0_27, %c0_28, %c0_29], %56 {strides = array<i32>} : memref<1x4x32x256xf32, #tpu.memory_space<vmem>>, vector<1x4x32x256xf32>,
    return
  }
  func.func @transform_0(%arg0: i32, %arg1: i32) -> (i32, i32, i32, i32) {
    %c0_i32 = arith.constant 0 : i32
    %c0_i32_0 = arith.constant 0 : i32
    %c0_i32_1 = arith.constant 0 : i32
    return %arg0, %c0_i32, %c0_i32_0, %arg1 : i32, i32, i32, i32
  }
  func.func @transform_1(%arg0: i32, %arg1: i32) -> (i32, i32) {
    %c0_i32 = arith.constant 0 : i32
    %c0_i32_0 = arith.constant 0 : i32
    %c0_i32_1 = arith.constant 0 : i32
    return %c0_i32, %c0_i32_0 : i32, i32
  }
  func.func @transform_2(%arg0: i32, %arg1: i32) -> (i32, i32) {
    %c0_i32 = arith.constant 0 : i32
    %c0_i32_0 = arith.constant 0 : i32
    %c0_i32_1 = arith.constant 0 : i32
    return %c0_i32, %c0_i32_0 : i32, i32
  }
  func.func @transform_3(%arg0: i32, %arg1: i32) -> (i32, i32) {
    %c0_i32 = arith.constant 0 : i32
    %c0_i32_0 = arith.constant 0 : i32
    %c0_i32_1 = arith.constant 0 : i32
    return %c0_i32, %c0_i32_0 : i32, i32
  }
  func.func @transform_4(%arg0: i32, %arg1: i32) -> (i32, i32) {
    %c0_i32 = arith.constant 0 : i32
    %c0_i32_0 = arith.constant 0 : i32
    %c0_i32_1 = arith.constant 0 : i32
    return %c0_i32, %c0_i32_0 : i32, i32
  }
  func.func @transform_5(%arg0: i32, %arg1: i32) -> i32 {
    %c0_i32 = arith.constant 0 : i32
    %c0_i32_0 = arith.constant 0 : i32
    return %c0_i32 : i32
  }
  func.func @transform_6(%arg0: i32, %arg1: i32) -> (i32, i32, i32) {
    %c0_i32 = arith.constant 0 : i32
    %c0_i32_0 = arith.constant 0 : i32
    return %arg0, %c0_i32, %arg1 : i32, i32, i32
  }
  func.func @transform_7(%arg0: i32, %arg1: i32) -> (i32, i32, i32, i32) {
    %c0_i32 = arith.constant 0 : i32
    %c0_i32_0 = arith.constant 0 : i32
    %c0_i32_1 = arith.constant 0 : i32
    return %arg0, %c0_i32, %c0_i32_0, %arg1 : i32, i32, i32, i32
  }
}

</mosaic_0001>

<bundles_post_ra>
// kernel: hyper_connections_pallas.1
= control target key start
LH: loop header
LB: loop body
LE: loop exit
PB: predicated region body
PF: predicated region fallthrough
CT: control target
= control target key end

     0   :  { %13 = vsyncpa [#allocation3], 0  ;;  %s1455_s24 = smov 0   ;;  %s1457_s25 = smov 0   ;;  %s2022_s0 = inlined_call_operand.vmem [shape: f32[2,4,32,256], index: 0, kind: input, shape index: {}, may-alias: {0,7}]   ;;  %s2023_s1 = inlined_call_operand.vmem [shape: f32[32,1], index: 1, kind: input, shape index: {}]   ;;  %s2024_s2 = inlined_call_operand.vmem [shape: f32[32,1], index: 2, kind: input, shape index: {}]   ;;  %s2025_s3 = inlined_call_operand.vmem [shape: f32[4,1], index: 3, kind: input, shape index: {}]   ;;  %s2026_s4 = inlined_call_operand.vmem [shape: f32[4,1], index: 4, kind: input, shape index: {}]   ;;  %s2027_s5 = inlined_call_operand.vmem [shape: f32[2], index: 5, kind: input, shape index: {}]   ;;  %s2028_s6 = inlined_call_operand.vmem [shape: f32[2,32,256], index: 6, kind: output, shape index: {0}]   ;;  %s2029_s7 = inlined_call_operand.vmem [shape: f32[2,4,32,256], index: 7, kind: output, shape index: {1}, may-alias: {0,7}]  }
   0x1   :  { %s1459_s26 = smov 0  }
   0x2 LB: > { %s1253_s27 = sadd.s32 4294967295, %s1411_s26   ;;  %s31_s28 = sadd.s32 1, %s1407_s25  ;;  %s1411_s26 = sphi %s1459_s26, %s19_s26   ;;  %s1407_s25 = sphi %s1457_s25, %s2183_s25   ;;  %s1403_s24 = sphi %s1455_s24, %s2182_s24  }
   0x3   : > { %p33_p0 = scmp.ge.s32.totalorder %s31_s28, 2  ;;  %p1255_p1 = scmp.ge.s32.totalorder %s1411_s26, 1 }
   0x4   : > { %p225_p2 = scmp.lt.s32.totalorder %s1411_s26, 3  ;;  %p1480_p4 = scmp.eq.s32.totalorder %s1253_s27, 0 }
   0x5   : > { %s2185_s28 = smov (%p33_p0, %s31_s28), 0  ;;  %s250_s10 = sshll.u32 %s2027_s5, 4  ;;  %s251_s10 = int_to_ptr.vmem [resolvable:$true] %s250_s10 }
   0x6   : > { %p1476_p3 = pnand %p1255_p1, %p225_p2  ;;  %s1370_s11 = scalar_lea.vmem %s251_s10, 16 }
   0x7   : > { %p1371_p7 = scmp.ne.s32.totalorder %s251_s10, %s1370_s11  ;;  %p1378_p11 = scmp.lt.s32.totalorder %s251_s10, %s251_s10 }
   0x8   : > { %p1276_p5 = pneg %p1476_p3  ;;  %p1379_p12 = scmp.lt.s32.totalorder %s1370_s11, %s1370_s11 }
   0xa   : > { %p1277_p6 = pnand %p1480_p4, %p1276_p5  ;;  %p1380_p13 = por %p1379_p12, %p1378_p11 }
   0xc   : > { %p1372_p8 = pneg %p1277_p6 }
   0xe   : > { %p1373_p9 = pnand %p1372_p8, %p1371_p7 }
  0x10   : > { %p1374_p10 = pneg %p1373_p9 }
  0x12   : > { %p1381_p0 = pnand %p1380_p13, %p1374_p10 }
  0x14   : > { %1384 = shalt.err (!%p1381_p0)
}
  0x15   : > { %s1413_s12 = smov [#allocation2]   ;;  %276 = sbr.rel (%p1476_p3) target bundleno = 278 (0x116), region = 44 }
  0x16   : > { %1279 = dma.vmem_to_smem (!%p1277_p6), %s251_s10, 16, %s1413_s12, [#allocation3]  }
  0x1a   : > { %1398 = dma.done.wait (%p1480_p4), [#allocation3], 16  }
  0x1b   : > { %1400 = vsyncadd (%p1480_p4), [#allocation3], 4294967280 }
  0x1c   : > { %282 = sfence }
  0x1d   : > { %v394_v0 = vld [vmem:[%s2023_s1 + $0x10] sm:$0xff]  ;;  %v392_v1 = vld [vmem:[%s2023_s1] sm:$0xff]  ;;  %v1414_v2 = vmov 0   ;;  %v395_v3 = vld [vmem:[%s2023_s1 + $0x18] sm:$0xff]  ;;  %p327_p1 = scmp.lt.s32.totalorder %s1403_s24, 1  ;;  %s1266_s18 = sld [smem:[#allocation2 + $0x1]] }
  0x1e   : > { %1309 = vset.pattern.permute.xlu1 %v1414_v2  ;;  %1308 = vset.pattern.permute.xlu0 %v1414_v2  ;;  %v393_v4 = vld [vmem:[%s2023_s1 + $0x8] sm:$0xff]  ;;  %v396_v6 = vld [vmem:[%s2024_s2] sm:$0xff]  ;;  %v399_v7 = vld [vmem:[%s2024_s2 + $0x18] sm:$0xff]  ;;  %s1841_s19 = sld [smem:[#allocation2]] }
  0x1f   : > { %524 = vperm.xlu1 %1309, %v394_v0   ;;  %514 = vperm.xlu0 %1308, %v392_v1   ;;  %v397_v5 = vld [vmem:[%s2024_s2 + $0x8] sm:$0xff]  ;;  %v398_v8 = vld [vmem:[%s2024_s2 + $0x10] sm:$0xff]  ;;  %v357_v9 = vld [vmem:[%s2026_s4] sm:$0xf]  ;;  %s2187_s24 = smov (!%p327_p1, %s1403_s24), 1 }
  0x20   : > { %v356_v10 = vld [vmem:[%s2025_s3] sm:$0xf]  ;;  %s1269_s14 = sshll.u32 %s2187_s24, 8  ;;  %s1270_s20 = sshll.u32 %s2187_s24, 6 }
  0x21   : > { %s1537_s17 = scalar_lea.vmem %s2022_s0, %s1269_s14  ;;  %s344_s23 = scalar_lea.vmem %s2028_s6, %s1270_s20 }
  0x22   : > { %v1540_v11 = vld [vmem:[%s1537_s17] sm:$0xff]  ;;  %v1543_v12 = vld [vmem:[%s1537_s17 + $0x10] sm:$0xff]  ;;  %v1546_v13 = vld [vmem:[%s1537_s17 + $0x8] sm:$0xff]  ;;  %s1931_s30 = scalar_lea.vmem %s2029_s7, %s1269_s14 }
  0x23   : > { %529 = vperm.xlu1 %1309, %v395_v3   ;;  %519 = vperm.xlu0 %1308, %v393_v4   ;;  %v1549_v14 = vld [vmem:[%s1537_s17 + $0x18] sm:$0xff]  ;;  %v1552_v15 = vld [vmem:[%s1537_s17 + $0x40] sm:$0xff]  ;;  %v1555_v16 = vld [vmem:[%s1537_s17 + $0x50] sm:$0xff]  ;;  %v400_v19 = vmul.f32 %v1540_v11, %v1540_v11  ;;  %v402_v20 = vmul.f32 %v1543_v12, %v1543_v12  ;;  %v401_v24 = vmul.f32 %v1546_v13, %v1546_v13 }
  0x24   : > { %2088 = vst [vmem:[#allocation5_spill] sm:$0xff] %v1555_v16  ;;  %v1558_v17 = vld [vmem:[%s1537_s17 + $0x48] sm:$0xff]  ;;  %v1561_v18 = vld [vmem:[%s1537_s17 + $0x58] sm:$0xff]  ;;  %v1568_v21 = vld [vmem:[%s1537_s17 + $0x20] sm:$0xff]  ;;  %v403_v25 = vmul.f32 %v1549_v14, %v1549_v14  ;;  %v408_v29 = vmul.f32 %v1552_v15, %v1552_v15  ;;  %v410_v30 = vmul.f32 %v1555_v16, %v1555_v16 }
  0x25   : > { %2089 = vst [vmem:[#allocation6_spill] sm:$0xff] %v1558_v17  ;;  %2090 = vst [vmem:[#allocation7_spill] sm:$0xff] %v1561_v18  ;;  %v1571_v22 = vld [vmem:[%s1537_s17 + $0x80] sm:$0xff]  ;;  %v1574_v23 = vld [vmem:[%s1537_s17 + $0x90] sm:$0xff]  ;;  %v409_v34 = vmul.f32 %v1558_v17, %v1558_v17  ;;  %v411_v35 = vmul.f32 %v1561_v18, %v1561_v18  ;;  %v404_v39 = vmul.f32 %v1568_v21, %v1568_v21 }
  0x26   : > { %2091 = vst [vmem:[#allocation8_spill] sm:$0xff] %v1568_v21  ;;  %2092 = vst [vmem:[#allocation9_spill] sm:$0xff] %v1571_v22  ;;  %v1581_v26 = vld [vmem:[%s1537_s17 + $0x28] sm:$0xff]  ;;  %v1587_v28 = vld [vmem:[%s1537_s17 + $0x98] sm:$0xff]  ;;  %v416_v40 = vmul.f32 %v1571_v22, %v1571_v22  ;;  %v418_v41 = vmul.f32 %v1574_v23, %v1574_v23  ;;  %v432_v42 = vadd.f32 %v402_v20, %v400_v19 }
  0x27   : > { %651 = vperm.xlu1 %1309, %v397_v5   ;;  %646 = vperm.xlu0 %1308, %v396_v6   ;;  %2093 = vst [vmem:[#allocation10_spill] sm:$0xff] %v1574_v23  ;;  %2094 = vst [vmem:[#allocation11_spill] sm:$0xff] %v1581_v26  ;;  %v1584_v27 = vld [vmem:[%s1537_s17 + $0x88] sm:$0xff]  ;;  %v1594_v31 = vld [vmem:[%s1537_s17 + $0x60] sm:$0xff]  ;;  %v405_v45 = vmul.f32 %v1581_v26, %v1581_v26  ;;  %v419_v47 = vmul.f32 %v1587_v28, %v1587_v28 }
  0x28   : > { %2095 = vst [vmem:[#allocation12_spill] sm:$0xff] %v1584_v27  ;;  %2096 = vst [vmem:[#allocation13_spill] sm:$0xff] %v1587_v28  ;;  %v1597_v32 = vld [vmem:[%s1537_s17 + $0x68] sm:$0xff]  ;;  %v1600_v33 = vld [vmem:[%s1537_s17 + $0xa0] sm:$0xff]  ;;  %v417_v46 = vmul.f32 %v1584_v27, %v1584_v27  ;;  %v441_v48 = vadd.f32 %v403_v25, %v401_v24  ;;  %v412_v51 = vmul.f32 %v1594_v31, %v1594_v31 }
  0x29   : > { %2097 = vst [vmem:[#allocation14_spill] sm:$0xff] %v1594_v31  ;;  %2098 = vst [vmem:[#allocation15_spill] sm:$0xff] %v1597_v32  ;;  %v1607_v36 = vld [vmem:[%s1537_s17 + $0xa8] sm:$0xff]  ;;  %v1610_v37 = vld [vmem:[%s1537_s17 + $0xc0] sm:$0xff]  ;;  %v413_v52 = vmul.f32 %v1597_v32, %v1597_v32  ;;  %v420_v53 = vmul.f32 %v1600_v33, %v1600_v33  ;;  %v450_v54 = vadd.f32 %v410_v30, %v408_v29 }
  0x2a   : > { %2099 = vst [vmem:[#allocation16_spill] sm:$0xff] %v1600_v33  ;;  %2100 = vst [vmem:[#allocation17_spill] sm:$0xff] %v1607_v36  ;;  %v1613_v38 = vld [vmem:[%s1537_s17 + $0x30] sm:$0xff]  ;;  %v1622_v43 = vld [vmem:[%s1537_s17 + $0xc8] sm:$0xff]  ;;  %v421_v57 = vmul.f32 %v1607_v36, %v1607_v36  ;;  %v424_v58 = vmul.f32 %v1610_v37, %v1610_v37  ;;  %v459_v59 = vadd.f32 %v411_v35, %v409_v34 }
  0x2b   : > { %661 = vperm.xlu1 %1309, %v399_v7   ;;  %656 = vperm.xlu0 %1308, %v398_v8   ;;  %2101 = vst [vmem:[#allocation18_spill] sm:$0xff] %v1610_v37  ;;  %2102 = vst [vmem:[#allocation19_spill] sm:$0xff] %v1613_v38  ;;  %v1625_v44 = vld [vmem:[%s1537_s17 + $0x38] sm:$0xff]  ;;  %v1634_v49 = vld [vmem:[%s1537_s17 + $0xd0] sm:$0xff]  ;;  %v406_v56 = vmul.f32 %v1613_v38, %v1613_v38  ;;  %v425_v0 = vmul.f32 %v1622_v43, %v1622_v43 }
  0x2c   : > { %2103 = vst [vmem:[#allocation20_spill] sm:$0xff] %v1622_v43  ;;  %2104 = vst [vmem:[#allocation21_spill] sm:$0xff] %v1625_v44  ;;  %v1637_v50 = vld [vmem:[%s1537_s17 + $0xd8] sm:$0xff]  ;;  %v1646_v55 = vld [vmem:[%s1537_s17 + $0x70] sm:$0xff]  ;;  %v407_v63 = vmul.f32 %v1625_v44, %v1625_v44  ;;  %v433_v1 = vadd.f32 %v432_v42, %v404_v39  ;;  %v468_v2 = vadd.f32 %v418_v41, %v416_v40 }
  0x2d   : > { %2105 = vst [vmem:[#allocation22_spill] sm:$0xff] %v1634_v49  ;;  %2106 = vst [vmem:[#allocation23_spill] sm:$0xff] %v1637_v50  ;;  %v1655_v60 = vld [vmem:[%s1537_s17 + $0xe0] sm:$0xff]  ;;  %v1658_v61 = vld [vmem:[%s1537_s17 + $0xe8] sm:$0xff]  ;;  %v426_v5 = vmul.f32 %v1634_v49, %v1634_v49  ;;  %v427_v6 = vmul.f32 %v1637_v50, %v1637_v50  ;;  %v442_v7 = vadd.f32 %v441_v48, %v405_v45 }
  0x2e   : > { %2107 = vst [vmem:[#allocation24_spill] sm:$0xff] %v1646_v55  ;;  %2108 = vst [vmem:[#allocation25_spill] sm:$0xff] %v1655_v60  ;;  %v1661_v62 = vld [vmem:[%s1537_s17 + $0x78] sm:$0xff]  ;;  %v1668_v3 = vld [vmem:[%s1537_s17 + $0xb0] sm:$0xff]  ;;  %v477_v8 = vadd.f32 %v419_v47, %v417_v46  ;;  %v428_v20 = vmul.f32 %v1655_v60, %v1655_v60  ;;  %v429_v24 = vmul.f32 %v1658_v61, %v1658_v61 }
  0x2f   : > { %863 = vperm.xlu1 %1309, %v357_v9   ;;  %819 = vperm.xlu0 %1308, %v356_v10   ;;  %2109 = vst [vmem:[#allocation26_spill] sm:$0xff] %v1658_v61  ;;  %2110 = vst [vmem:[#allocation27_spill] sm:$0xff] %v1661_v62  ;;  %v1671_v4 = vld [vmem:[%s1537_s17 + $0xb8] sm:$0xff]  ;;  %v414_v9 = vmul.f32 %v1646_v55, %v1646_v55  ;;  %v451_v10 = vadd.f32 %v450_v54, %v412_v51  ;;  %v1690_v39 = vld [vmem:[%s1537_s17 + $0xf0] sm:$0xff] }
  0x30   : > { %2111 = vst [vmem:[#allocation28_spill] sm:$0xff] %v1668_v3  ;;  %2112 = vst [vmem:[#allocation29_spill] sm:$0xff] %v1671_v4  ;;  %v415_v19 = vmul.f32 %v1661_v62, %v1661_v62  ;;  %v460_v25 = vadd.f32 %v459_v59, %v413_v52  ;;  %v422_v29 = vmul.f32 %v1668_v3, %v1668_v3  ;;  %v1693_v40 = vld [vmem:[%s1537_s17 + $0xf8] sm:$0xff] }
  0x31   : > { %v423_v30 = vmul.f32 %v1671_v4, %v1671_v4  ;;  %v434_v34 = vadd.f32 %v433_v1, %v406_v56  ;;  %v469_v35 = vadd.f32 %v468_v2, %v420_v53  ;;  %2113 = vst [vmem:[#allocation30_spill] sm:$0xff] %v1690_v39  ;;  %2114 = vst [vmem:[#allocation31_spill] sm:$0xff] %v1693_v40 }
  0x32   : > { %v443_v41 = vadd.f32 %v442_v7, %v407_v63  ;;  %v478_v42 = vadd.f32 %v477_v8, %v421_v57  ;;  %v486_v45 = vadd.f32 %v426_v5, %v424_v58  ;;  %v495_v46 = vadd.f32 %v427_v6, %v425_v0 }
  0x33   : > { %v452_v47 = vadd.f32 %v451_v10, %v414_v9  ;;  %v461_v48 = vadd.f32 %v460_v25, %v415_v19  ;;  %v430_v51 = vmul.f32 %v1690_v39, %v1690_v39  ;;  %v431_v52 = vmul.f32 %v1693_v40, %v1693_v40 }
  0x34   : > { %v435_v54 = vrot.slane %v434_v34, 4  ;;  %v470_v59 = vadd.f32 %v469_v35, %v422_v29  ;;  %v444_v56 = vrot.slane %v443_v41, 4  ;;  %v479_v53 = vadd.f32 %v478_v42, %v423_v30 }
  0x35   : > { %v487_v1 = vadd.f32 %v486_v45, %v428_v20  ;;  %v496_v2 = vadd.f32 %v495_v46, %v429_v24  ;;  %v453_v50 = vrot.slane %v452_v47, 4  ;;  %v462_v49 = vrot.slane %v461_v48, 4 }
  0x36   : > { %v436_v63 = vadd.f32 %v435_v54, %v434_v34  ;;  %v471_v57 = vrot.slane %v470_v59, 4  ;;  %v445_v58 = vadd.f32 %v444_v56, %v443_v41  ;;  %v480_v0 = vrot.slane %v479_v53, 4 }
  0x37   : > { %v488_v5 = vadd.f32 %v487_v1, %v430_v51  ;;  %v497_v6 = vadd.f32 %v496_v2, %v431_v52  ;;  %v454_v7 = vadd.f32 %v453_v50, %v452_v47  ;;  %v463_v8 = vadd.f32 %v462_v49, %v461_v48 }
  0x38   : > { %v437_v9 = vrot.slane %v436_v63, 2  ;;  %v472_v10 = vadd.f32 %v471_v57, %v470_v59  ;;  %v446_v19 = vrot.slane %v445_v58, 2  ;;  %v481_v25 = vadd.f32 %v480_v0, %v479_v53 }
  0x39   : > { %v489_v28 = vrot.slane %v488_v5, 4  ;;  %v498_v29 = vrot.slane %v497_v6, 4  ;;  %v455_v35 = vrot.slane %v454_v7, 2  ;;  %v464_v30 = vrot.slane %v463_v8, 2 }
  0x3a   : > { %v438_v20 = vadd.f32 %v437_v9, %v436_v63  ;;  %v473_v24 = vrot.slane %v472_v10, 2  ;;  %v447_v42 = vadd.f32 %v446_v19, %v445_v58  ;;  %v482_v45 = vrot.slane %v481_v25, 2 }
  0x3b   : > { %v490_v34 = vadd.f32 %v489_v28, %v488_v5  ;;  %v499_v46 = vadd.f32 %v498_v29, %v497_v6  ;;  %v456_v41 = vadd.f32 %v455_v35, %v454_v7  ;;  %v465_v54 = vadd.f32 %v464_v30, %v463_v8 }
  0x3c   : > { %v439_v51 = vrot.slane %v438_v20, 1  ;;  %v474_v52 = vadd.f32 %v473_v24, %v472_v10  ;;  %v448_v50 = vrot.slane %v447_v42, 1  ;;  %v483_v49 = vadd.f32 %v482_v45, %v481_v25  ;;  %v2116_v45 = vld [vmem:[#allocation13_spill] sm:$0xff] }
  0x3d   : > { %v491_v47 = vrot.slane %v490_v34, 2  ;;  %v500_v48 = vrot.slane %v499_v46, 2  ;;  %v457_v59 = vrot.slane %v456_v41, 1  ;;  %v466_v56 = vrot.slane %v465_v54, 1 }
  0x3e   : > { %v440_v53 = vadd.f32 %v439_v51, %v438_v20  ;;  %v475_v1 = vrot.slane %v474_v52, 1  ;;  %v449_v2 = vadd.f32 %v448_v50, %v447_v42  ;;  %v484_v57 = vrot.slane %v483_v49, 1 }
  0x3f   : > { %v492_v63 = vadd.f32 %v491_v47, %v490_v34  ;;  %v501_v0 = vadd.f32 %v500_v48, %v499_v46  ;;  %v458_v58 = vadd.f32 %v457_v59, %v456_v41  ;;  %v467_v9 = vadd.f32 %v466_v56, %v465_v54 }
  0x40   : > { %v476_v28 = vadd.f32 %v475_v1, %v474_v52  ;;  %v776_v5 = vmax.f32 %v440_v53, 1e-24  ;;  %v485_v6 = vadd.f32 %v484_v57, %v483_v49  ;;  %v777_v10 = vmax.f32 %v449_v2, 1e-24 }
  0x41   : > { %v493_v7 = vrot.slane %v492_v63, 1  ;;  %v502_v8 = vrot.slane %v501_v0, 1  ;;  %v778_v19 = vmax.f32 %v458_v58, 1e-24  ;;  %v779_v25 = vmax.f32 %v467_v9, 1e-24 }
  0x42   : > { %v780_v29 = vmax.f32 %v476_v28, 1e-24  ;;  %1310 = vrsqrt.f32 %v776_v5  ;;  %v781_v20 = vmax.f32 %v485_v6, 1e-24 }
  0x43   : > { %v1699_v35 = vadd.f32 %v493_v7, %v492_v63  ;;  %v1701_v30 = vadd.f32 %v502_v8, %v501_v0  ;;  %1312 = vrsqrt.f32 %v777_v10 }
  0x44   : > { %1314 = vrsqrt.f32 %v778_v19 }
  0x45   : > { %1316 = vrsqrt.f32 %v779_v25 }
  0x46   : > { %1318 = vrsqrt.f32 %v780_v29 }
  0x47   : > { %1320 = vrsqrt.f32 %v781_v20 }
  0x9a   : > { %v525_v24 = vpop.permute.xlu1 %524  ;;  %v515_v42 = vpop.permute.xlu0 %514 }
  0x9b   : > { %v536_v46 = vmul.f32 %v525_v24, %v1568_v21  ;;  %v537_v41 = vmul.f32 %v525_v24, %v1581_v26  ;;  %v544_v54 = vmul.f32 %v525_v24, %v1594_v31  ;;  %v545_v51 = vmul.f32 %v525_v24, %v1597_v32 }
  0x9c   : > { %v552_v52 = vmul.f32 %v525_v24, %v1600_v33  ;;  %v553_v50 = vmul.f32 %v525_v24, %v1607_v36  ;;  %v560_v49 = vmul.f32 %v525_v24, %v1655_v60  ;;  %v561_v47 = vmul.f32 %v525_v24, %v1658_v61  ;;  %v2117_v60 = vld [vmem:[#allocation22_spill] sm:$0xff]  ;;  %v2118_v33 = vld [vmem:[#allocation23_spill] sm:$0xff] }
  0x9d   : > { %v532_v48 = vmul.f32 %v515_v42, %v1540_v11  ;;  %v533_v59 = vmul.f32 %v515_v42, %v1546_v13  ;;  %v540_v56 = vmul.f32 %v515_v42, %v1552_v15  ;;  %v541_v53 = vmul.f32 %v515_v42, %v1558_v17 }
  0x9e   : > { %v548_v1 = vmul.f32 %v515_v42, %v1571_v22  ;;  %v549_v2 = vmul.f32 %v515_v42, %v1584_v27  ;;  %v556_v57 = vmul.f32 %v515_v42, %v1610_v37  ;;  %v557_v63 = vmul.f32 %v515_v42, %v1622_v43  ;;  %v530_v0 = vpop.permute.xlu1 %529  ;;  %v520_v58 = vpop.permute.xlu0 %519 }
  0x9f   : > { %v538_v9 = vmul.f32 %v530_v0, %v1613_v38  ;;  %v539_v28 = vmul.f32 %v530_v0, %v1625_v44  ;;  %v546_v5 = vmul.f32 %v530_v0, %v1646_v55  ;;  %v547_v6 = vmul.f32 %v530_v0, %v1661_v62  ;;  %v1733_v42 = vpop.eup %1310 }
  0xa0   : > { %v554_v7 = vmul.f32 %v530_v0, %v1668_v3  ;;  %v555_v8 = vmul.f32 %v530_v0, %v1671_v4  ;;  %v562_v10 = vmul.f32 %v530_v0, %v1690_v39  ;;  %v563_v19 = vmul.f32 %v530_v0, %v1693_v40  ;;  %2115 = vst [vmem:[#allocation32_spill] sm:$0xff] %v1733_v42  ;;  %v1739_v31 = vpop.eup %1312 }
  0xa1   : > { %v534_v25 = vmul.f32 %v520_v58, %v1543_v12  ;;  %v535_v29 = vmul.f32 %v520_v58, %v1549_v14  ;;  %v542_v20 = vmul.f32 %v520_v58, %v1555_v16  ;;  %v543_v24 = vmul.f32 %v520_v58, %v1561_v18  ;;  %2119 = vst [vmem:[#allocation33_spill] sm:$0xff] %v1739_v31  ;;  %v1741_v39 = vpop.eup %1314 }
  0xa2   : > { %v550_v34 = vmul.f32 %v520_v58, %v1574_v23  ;;  %v551_v61 = vmul.f32 %v520_v58, %v2116_v45  ;;  %v558_v36 = vmul.f32 %v520_v58, %v2117_v60  ;;  %v559_v32 = vmul.f32 %v520_v58, %v2118_v33  ;;  %v1743_v55 = vpop.eup %1316 }
  0xa3   : > { %v564_v0 = vadd.f32 %v534_v25, %v532_v48  ;;  %v573_v26 = vadd.f32 %v535_v29, %v533_v59  ;;  %v582_v21 = vadd.f32 %v542_v20, %v540_v56  ;;  %v591_v40 = vadd.f32 %v543_v24, %v541_v53  ;;  %v1745_v27 = vpop.eup %1318 }
  0xa4   : > { %v600_v4 = vadd.f32 %v550_v34, %v548_v1  ;;  %v609_v3 = vadd.f32 %v551_v61, %v549_v2  ;;  %v618_v62 = vadd.f32 %v558_v36, %v556_v57  ;;  %v627_v42 = vadd.f32 %v559_v32, %v557_v63  ;;  %v1747_v56 = vpop.eup %1320  ;;  %v647_v63 = vpop.permute.xlu0 %646 }
  0xa5   : > { %v565_v44 = vadd.f32 %v564_v0, %v536_v46  ;;  %v574_v38 = vadd.f32 %v573_v26, %v537_v41  ;;  %v583_v43 = vadd.f32 %v582_v21, %v544_v54  ;;  %v592_v37 = vadd.f32 %v591_v40, %v545_v51 }
  0xa6   : > { %v601_v58 = vadd.f32 %v600_v4, %v552_v52  ;;  %v610_v31 = vadd.f32 %v609_v3, %v553_v50  ;;  %v619_v48 = vadd.f32 %v618_v62, %v560_v49  ;;  %v628_v59 = vadd.f32 %v627_v42, %v561_v47  ;;  %v2129_v50 = vld [vmem:[#allocation28_spill] sm:$0xff] }
  0xa7   : > { %v566_v53 = vadd.f32 %v565_v44, %v538_v9  ;;  %v575_v25 = vadd.f32 %v574_v38, %v539_v28  ;;  %v584_v34 = vadd.f32 %v583_v43, %v546_v5  ;;  %v593_v61 = vadd.f32 %v592_v37, %v547_v6  ;;  %v652_v44 = vpop.permute.xlu1 %651  ;;  %v2128_v9 = vld [vmem:[#allocation27_spill] sm:$0xff] }
  0xa8   : > { %v602_v36 = vadd.f32 %v601_v58, %v554_v7  ;;  %v611_v32 = vadd.f32 %v610_v31, %v555_v8  ;;  %v620_v1 = vadd.f32 %v619_v48, %v562_v10  ;;  %v629_v2 = vadd.f32 %v628_v59, %v563_v19  ;;  %v2122_v58 = vld [vmem:[#allocation12_spill] sm:$0xff] }
  0xa9   : > { %v567_v46 = vrot.slane %v566_v53, 4  ;;  %v576_v26 = vrot.slane %v575_v25, 4  ;;  %v585_v21 = vrot.slane %v584_v34, 4  ;;  %v594_v40 = vrot.slane %v593_v61, 4 }
  0xaa   : > { %v603_v41 = vrot.slane %v602_v36, 4  ;;  %v612_v54 = vrot.slane %v611_v32, 4  ;;  %v621_v4 = vrot.slane %v620_v1, 4  ;;  %v630_v3 = vrot.slane %v629_v2, 4 }
  0xab   : > { %v1749_v62 = vadd.f32 %v585_v21, %v584_v34  ;;  %v1751_v51 = vadd.f32 %v594_v40, %v593_v61  ;;  %v2120_v38 = vmax.f32 %v1699_v35, 1e-24  ;;  %v1755_v37 = vadd.f32 %v567_v46, %v566_v53  ;;  %v662_v59 = vpop.permute.xlu1 %661  ;;  %v2123_v53 = vld [vmem:[#allocation18_spill] sm:$0xff]  ;;  %v2124_v34 = vld [vmem:[#allocation20_spill] sm:$0xff]  ;;  %v657_v21 = vpop.permute.xlu0 %656 }
  0xac   : > { %v1757_v31 = vadd.f32 %v576_v26, %v575_v25  ;;  %v1759_v43 = vadd.f32 %v603_v41, %v602_v36  ;;  %v2121_v52 = vmax.f32 %v1701_v30, 1e-24  ;;  %v1764_v49 = vadd.f32 %v612_v54, %v611_v32  ;;  %v2125_v54 = vld [vmem:[#allocation19_spill] sm:$0xff] }
  0xad   : > { %1322 = vrsqrt.f32 %v2120_v38  ;;  %v1766_v47 = vadd.f32 %v621_v4, %v620_v1  ;;  %v1768_v57 = vadd.f32 %v630_v3, %v629_v2  ;;  %v666_v28 = vmul.f32 %v652_v44, %v1543_v12  ;;  %v2126_v3 = vld [vmem:[#allocation21_spill] sm:$0xff]  ;;  %v2127_v38 = vld [vmem:[#allocation24_spill] sm:$0xff] }
  0xae   : > { %1324 = vrsqrt.f32 %v2121_v52  ;;  %v667_v5 = vmul.f32 %v652_v44, %v1549_v14  ;;  %v674_v30 = vmul.f32 %v652_v44, %v1555_v16  ;;  %v675_v6 = vmul.f32 %v652_v44, %v1561_v18 }
  0xaf   : > { %v682_v7 = vmul.f32 %v652_v44, %v1574_v23  ;;  %v683_v8 = vmul.f32 %v652_v44, %v2116_v45  ;;  %v690_v10 = vmul.f32 %v652_v44, %v2117_v60  ;;  %v691_v19 = vmul.f32 %v652_v44, %v2118_v33 }
  0xb0   : > { %v664_v29 = vmul.f32 %v647_v63, %v1540_v11  ;;  %v665_v20 = vmul.f32 %v647_v63, %v1546_v13  ;;  %v672_v24 = vmul.f32 %v647_v63, %v1552_v15  ;;  %v673_v42 = vmul.f32 %v647_v63, %v1558_v17 }
  0xb1   : > { %v680_v0 = vmul.f32 %v647_v63, %v1571_v22  ;;  %v681_v48 = vmul.f32 %v647_v63, %v2122_v58  ;;  %v688_v25 = vmul.f32 %v647_v63, %v2123_v53  ;;  %v689_v61 = vmul.f32 %v647_v63, %v2124_v34  ;;  %v2130_v63 = vld [vmem:[#allocation29_spill] sm:$0xff] }
  0xb2   : > { %v696_v36 = vadd.f32 %v666_v28, %v664_v29  ;;  %v705_v32 = vadd.f32 %v667_v5, %v665_v20  ;;  %v714_v1 = vadd.f32 %v674_v30, %v672_v24  ;;  %v723_v2 = vadd.f32 %v675_v6, %v673_v42  ;;  %v2131_v5 = vld [vmem:[#allocation30_spill] sm:$0xff]  ;;  %v2132_v6 = vld [vmem:[#allocation31_spill] sm:$0xff]  ;;  %v2139_v53 = vld [vmem:[#allocation25_spill] sm:$0xff] }
  0xb3   : > { %v732_v46 = vadd.f32 %v682_v7, %v680_v0  ;;  %v741_v26 = vadd.f32 %v683_v8, %v681_v48  ;;  %v750_v40 = vadd.f32 %v690_v10, %v688_v25  ;;  %v759_v41 = vadd.f32 %v691_v19, %v689_v61  ;;  %v2133_v8 = vld [vmem:[#allocation8_spill] sm:$0xff]  ;;  %v2134_v10 = vld [vmem:[#allocation11_spill] sm:$0xff]  ;;  %v2135_v20 = vld [vmem:[#allocation14_spill] sm:$0xff] }
  0xb4   : > { %v670_v4 = vmul.f32 %v662_v59, %v2125_v54  ;;  %v671_v44 = vmul.f32 %v662_v59, %v2126_v3  ;;  %v678_v52 = vmul.f32 %v662_v59, %v2127_v38  ;;  %v679_v35 = vmul.f32 %v662_v59, %v2128_v9  ;;  %v2136_v42 = vld [vmem:[#allocation15_spill] sm:$0xff]  ;;  %v2137_v48 = vld [vmem:[#allocation16_spill] sm:$0xff]  ;;  %v2138_v61 = vld [vmem:[#allocation17_spill] sm:$0xff] }
  0xb5   : > { %v686_v33 = vmul.f32 %v662_v59, %v2129_v50  ;;  %v687_v28 = vmul.f32 %v662_v59, %v2130_v63  ;;  %v694_v30 = vmul.f32 %v662_v59, %v2131_v5  ;;  %v695_v7 = vmul.f32 %v662_v59, %v2132_v6  ;;  %v2140_v50 = vld [vmem:[#allocation26_spill] sm:$0xff] }
  0xb6   : > { %v668_v29 = vmul.f32 %v657_v21, %v2133_v8  ;;  %v669_v19 = vmul.f32 %v657_v21, %v2134_v10  ;;  %v676_v24 = vmul.f32 %v657_v21, %v2135_v20  ;;  %v677_v0 = vmul.f32 %v657_v21, %v2136_v42 }
  0xb7   : > { %v684_v25 = vmul.f32 %v657_v21, %v2137_v48  ;;  %v685_v60 = vmul.f32 %v657_v21, %v2138_v61  ;;  %v692_v63 = vmul.f32 %v657_v21, %v2139_v53  ;;  %v693_v5 = vmul.f32 %v657_v21, %v2140_v50 }
  0xb8   : > { %v697_v45 = vadd.f32 %v696_v36, %v668_v29  ;;  %v706_v59 = vadd.f32 %v705_v32, %v669_v19  ;;  %v715_v23 = vadd.f32 %v714_v1, %v676_v24  ;;  %v724_v58 = vadd.f32 %v723_v2, %v677_v0 }
  0xb9   : > { %v733_v22 = vadd.f32 %v732_v46, %v684_v25  ;;  %v742_v9 = vadd.f32 %v741_v26, %v685_v60  ;;  %v751_v20 = vadd.f32 %v750_v40, %v692_v63  ;;  %v760_v48 = vadd.f32 %v759_v41, %v693_v5 }
  0xba   : > { %v1802_v34 = vpop.eup %1322  ;;  %v698_v38 = vadd.f32 %v697_v45, %v670_v4  ;;  %v707_v42 = vadd.f32 %v706_v59, %v671_v44  ;;  %v716_v18 = vadd.f32 %v715_v23, %v678_v52  ;;  %v725_v61 = vadd.f32 %v724_v58, %v679_v35 }
  0xbb   : > { %v1806_v6 = vpop.eup %1324  ;;  %v734_v16 = vadd.f32 %v733_v22, %v686_v33  ;;  %v743_v17 = vadd.f32 %v742_v9, %v687_v28  ;;  %v752_v54 = vadd.f32 %v751_v20, %v694_v30  ;;  %v761_v21 = vadd.f32 %v760_v48, %v695_v7 }
  0xbc   : > { %v699_v3 = vrot.slane %v698_v38, 4  ;;  %v708_v53 = vrot.slane %v707_v42, 4  ;;  %v717_v36 = vrot.slane %v716_v18, 4  ;;  %v726_v32 = vrot.slane %v725_v61, 4 }
  0xbd   : > { %v735_v29 = vrot.slane %v734_v16, 4  ;;  %v744_v19 = vrot.slane %v743_v17, 4  ;;  %v753_v46 = vrot.slane %v752_v54, 4  ;;  %v762_v60 = vrot.slane %v761_v21, 4 }
  0xbe   : > { %v700_v1 = vadd.f32 %v699_v3, %v698_v38  ;;  %v709_v2 = vadd.f32 %v708_v53, %v707_v42  ;;  %v718_v45 = vadd.f32 %v717_v36, %v716_v18  ;;  %v727_v26 = vadd.f32 %v726_v32, %v725_v61 }
  0xbf   : > { %v736_v40 = vadd.f32 %v735_v29, %v734_v16  ;;  %v745_v41 = vadd.f32 %v744_v19, %v743_v17  ;;  %v754_v22 = vadd.f32 %v753_v46, %v752_v54  ;;  %v763_v33 = vadd.f32 %v762_v60, %v761_v21  ;;  %v2142_v46 = vld [vmem:[#allocation33_spill] sm:$0xff] }
  0xc0   : > { %v701_v23 = vrot.slane %v700_v1, 2  ;;  %v710_v35 = vrot.slane %v709_v2, 2  ;;  %v719_v9 = vrot.slane %v718_v45, 2  ;;  %v728_v58 = vrot.slane %v727_v26, 2 }
  0xc1   : > { %v737_v4 = vrot.slane %v736_v40, 2  ;;  %v746_v44 = vrot.slane %v745_v41, 2  ;;  %v755_v52 = vrot.slane %v754_v22, 2  ;;  %v764_v63 = vrot.slane %v763_v33, 2 }
  0xc2   : > { %v702_v28 = vadd.f32 %v701_v23, %v700_v1  ;;  %v711_v5 = vadd.f32 %v710_v35, %v709_v2  ;;  %v720_v3 = vadd.f32 %v719_v9, %v718_v45  ;;  %v729_v53 = vadd.f32 %v728_v58, %v727_v26  ;;  %v2141_v1 = vld [vmem:[#allocation32_spill] sm:$0xff] }
  0xc3   : > { %v738_v38 = vadd.f32 %v737_v4, %v736_v40  ;;  %v747_v30 = vadd.f32 %v746_v44, %v745_v41  ;;  %v756_v18 = vadd.f32 %v755_v52, %v754_v22  ;;  %v765_v7 = vadd.f32 %v764_v63, %v763_v33 }
  0xc4   : > { %v703_v16 = vrot.slane %v702_v28, 1  ;;  %v712_v17 = vrot.slane %v711_v5, 1  ;;  %v721_v20 = vrot.slane %v720_v3, 1  ;;  %v730_v24 = vrot.slane %v729_v53, 1 }
  0xc5   : > { %v739_v54 = vrot.slane %v738_v38, 1  ;;  %v748_v42 = vrot.slane %v747_v30, 1  ;;  %v757_v25 = vrot.slane %v756_v18, 1  ;;  %v766_v61 = vrot.slane %v765_v7, 1 }
  0xc6   : > { %v704_v0 = vadd.f32 %v703_v16, %v702_v28  ;;  %v713_v48 = vadd.f32 %v712_v17, %v711_v5  ;;  %v722_v59 = vadd.f32 %v721_v20, %v720_v3  ;;  %v731_v21 = vadd.f32 %v730_v24, %v729_v53 }
  0xc7   : > { %v740_v36 = vadd.f32 %v739_v54, %v738_v38  ;;  %v749_v32 = vadd.f32 %v748_v42, %v747_v30  ;;  %v758_v29 = vadd.f32 %v757_v25, %v756_v18  ;;  %v767_v19 = vadd.f32 %v766_v61, %v765_v7 }
  0xc8   : > { %v836_v2 = vmul.f32 %v2141_v1, %v704_v0  ;;  %v837_v60 = vmul.f32 %v2142_v46, %v713_v48  ;;  %v614_v45 = vrot.slane %v1764_v49, 2  ;;  %v623_v26 = vrot.slane %v1766_v47, 2 }
  0xc9   : > { %v838_v40 = vmul.f32 %v1741_v39, %v722_v59  ;;  %v839_v41 = vmul.f32 %v1743_v55, %v731_v21  ;;  %v632_v23 = vrot.slane %v1768_v57, 2  ;;  %v840_v35 = vmul.f32 %v1745_v27, %v740_v36 }
  0xca   : > { %v841_v22 = vmul.f32 %v1747_v56, %v749_v32  ;;  %1326 = vtanh.f32 %v836_v2  ;;  %v842_v33 = vmul.f32 %v1802_v34, %v758_v29  ;;  %v843_v9 = vmul.f32 %v1806_v6, %v767_v19 }
  0xcb   : > { %1328 = vtanh.f32 %v837_v60  ;;  %v569_v58 = vrot.slane %v1755_v37, 2  ;;  %v578_v4 = vrot.slane %v1757_v31, 2  ;;  %v2143_v44 = vrot.slane %v1749_v62, 2  ;;  %v864_v60 = vpop.permute.xlu1 %863 }
  0xcc   : > { %1330 = vtanh.f32 %v838_v40  ;;  %v2144_v63 = vrot.slane %v1751_v51, 2  ;;  %v2145_v3 = vrot.slane %v1759_v43, 2  ;;  %v615_v38 = vadd.f32 %v614_v45, %v1764_v49 }
  0xcd   : > { %v588_v52 = vadd.f32 %v2143_v44, %v1749_v62  ;;  %1332 = vtanh.f32 %v839_v41  ;;  %v570_v5 = vadd.f32 %v569_v58, %v1755_v37  ;;  %v579_v30 = vadd.f32 %v578_v4, %v1757_v31  ;;  %v820_v44 = vpop.permute.xlu0 %819 }
  0xce   : > { %v597_v28 = vadd.f32 %v2144_v63, %v1751_v51  ;;  %v606_v53 = vadd.f32 %v2145_v3, %v1759_v43  ;;  %1334 = vtanh.f32 %v840_v35  ;;  %v616_v17 = vrot.slane %v615_v38, 1 }
  0xcf   : > { %v589_v18 = vrot.slane %v588_v52, 1  ;;  %1336 = vtanh.f32 %v841_v22  ;;  %v571_v62 = vrot.slane %v570_v5, 1  ;;  %v580_v51 = vrot.slane %v579_v30, 1 }
  0xd0   : > { %v598_v7 = vrot.slane %v597_v28, 1  ;;  %v607_v16 = vrot.slane %v606_v53, 1  ;;  %1338 = vtanh.f32 %v842_v33  ;;  %v617_v43 = vadd.f32 %v616_v17, %v615_v38 }
  0xd1   : > { %v590_v20 = vadd.f32 %v589_v18, %v588_v52  ;;  %1340 = vtanh.f32 %v843_v9  ;;  %v572_v24 = vadd.f32 %v571_v62, %v570_v5  ;;  %v581_v42 = vadd.f32 %v580_v51, %v579_v30 }
  0xd2   : > { %v599_v37 = vadd.f32 %v598_v7, %v597_v28  ;;  %v608_v54 = vadd.f32 %v607_v16, %v606_v53  ;;  %v624_v49 = vadd.f32 %v623_v26, %v1766_v47  ;;  %v633_v31 = vadd.f32 %v632_v23, %v1768_v57 }
  0xd3   : > { %v794_v0 = vmul.f32 %v1741_v39, %v590_v20  ;;  %v792_v48 = vmul.f32 %v2141_v1, %v572_v24  ;;  %v793_v36 = vmul.f32 %v2142_v46, %v581_v42  ;;  %v797_v32 = vmul.f32 %v1747_v56, %v617_v43 }
  0xd4   : > { %v795_v25 = vmul.f32 %v1743_v55, %v599_v37  ;;  %v796_v61 = vmul.f32 %v1745_v27, %v608_v54  ;;  %v625_v59 = vrot.slane %v624_v49, 1  ;;  %v634_v21 = vrot.slane %v633_v31, 1 }
  0xd5   : > { %1342 = vtanh.f32 %v794_v0  ;;  %v852_v19 = vstv %s1266_s18  ;;  %v880_v2 = vlaneseq  ;;  %v865_v58 = vrot.slane %v864_v60, 1 }
  0xd6   : > { %1344 = vtanh.f32 %v792_v48  ;;  %v626_v47 = vadd.f32 %v625_v59, %v624_v49  ;;  %v635_v57 = vadd.f32 %v634_v21, %v633_v31  ;;  %v808_v4 = vstv %s1841_s19 }
  0xd7   : > { %1346 = vtanh.f32 %v793_v36  ;;  %v1327_v39 = vpop.eup %1326  ;;  %v881_v22 = vshrl.u32 %v880_v2, 7  ;;  %v866_v63 = vrot.slane %v864_v60, 2  ;;  %v867_v3 = vrot.slane %v864_v60, 3 }
  0xd8   : > { %1348 = vtanh.f32 %v795_v25  ;;  %v1329_v29 = vpop.eup %1328  ;;  %v798_v55 = vmul.f32 %v1802_v34, %v626_v47  ;;  %v799_v27 = vmul.f32 %v1806_v6, %v635_v57  ;;  %v853_v45 = vmul.f32 %v1327_v39, %v852_v19 }
  0xd9   : > { %1350 = vtanh.f32 %v796_v61  ;;  %v1331_v1 = vpop.eup %1330  ;;  %v854_v26 = vmul.f32 %v1329_v29, %v852_v19  ;;  %v882_v18 = vsub.s32 0, %v881_v22  ;;  %v821_v16 = vrot.slane %v820_v44, 1 }
  0xda   : > { %1352 = vtanh.f32 %v797_v32  ;;  %v1333_v46 = vpop.eup %1332  ;;  %v855_v41 = vmul.f32 %v1331_v1, %v852_v19  ;;  %v872_v28 = vadd.f32 %v864_v60, %v853_v45  ;;  %v822_v37 = vrot.slane %v820_v44, 2 }
  0xdb   : > { %1354 = vtanh.f32 %v798_v55  ;;  %v1335_v56 = vpop.eup %1334  ;;  %v856_v23 = vmul.f32 %v1333_v46, %v852_v19  ;;  %v873_v5 = vadd.f32 %v864_v60, %v854_v26  ;;  %v823_v24 = vrot.slane %v820_v44, 3 }
  0xdc   : > { %1356 = vtanh.f32 %v799_v27  ;;  %v1337_v40 = vpop.eup %1336  ;;  %v857_v34 = vmul.f32 %v1335_v56, %v852_v19  ;;  %v874_v53 = vadd.f32 %v865_v58, %v855_v41  ;;  %v1846_v42 = vrot.slane %v872_v28, %v882_v18 }
  0xdd   : > { %v1339_v35 = vpop.eup %1338  ;;  %v858_v33 = vmul.f32 %v1337_v40, %v852_v19  ;;  %v875_v38 = vadd.f32 %v865_v58, %v856_v23  ;;  %v1848_v49 = vrot.slane %v873_v5, %v882_v18 }
  0xde   : > { %v1341_v6 = vpop.eup %1340  ;;  %v859_v9 = vmul.f32 %v1339_v35, %v852_v19  ;;  %v876_v7 = vadd.f32 %v866_v63, %v857_v34  ;;  %v1850_v48 = vrot.slane %v874_v53, %v882_v18 }
  0xdf   : > { %v860_v52 = vmul.f32 %v1341_v6, %v852_v19  ;;  %v877_v62 = vadd.f32 %v866_v63, %v858_v33  ;;  %v1852_v25 = vrot.slane %v875_v38, %v882_v18  ;;  %v2147_v38 = vld [vmem:[#allocation21_spill] sm:$0xff] }
  0xe0   : > { %v878_v51 = vadd.f32 %v867_v3, %v859_v9  ;;  %v1854_v36 = vrot.slane %v876_v7, %v882_v18  ;;  %v2148_v7 = vld [vmem:[#allocation6_spill] sm:$0xff] }
  0xe1   : > { %v879_v43 = vadd.f32 %v867_v3, %v860_v52  ;;  %v1856_v32 = vrot.slane %v877_v62, %v882_v18 }
  0xe2   : > { %v1343_v30 = vpop.eup %1342  ;;  %v1858_v29 = vrot.slane %v878_v51, %v882_v18  ;;  %v2151_v51 = vld [vmem:[#allocation14_spill] sm:$0xff] }
  0xe3   : > { %v1345_v17 = vpop.eup %1344  ;;  %v811_v20 = vmul.f32 %v1343_v30, %v808_v4  ;;  %v1860_v2 = vrot.slane %v879_v43, %v882_v18 }
  0xe4   : > { %v1347_v54 = vpop.eup %1346  ;;  %v809_v31 = vmul.f32 %v1345_v17, %v808_v4  ;;  %v2150_v17 = vld [vmem:[#allocation7_spill] sm:$0xff] }
  0xe5   : > { %v1349_v0 = vpop.eup %1348  ;;  %v810_v61 = vmul.f32 %v1347_v54, %v808_v4  ;;  %v830_v59 = vadd.f32 %v821_v16, %v811_v20  ;;  %v2154_v54 = vld [vmem:[#allocation27_spill] sm:$0xff] }
  0xe6   : > { %v1351_v21 = vpop.eup %1350  ;;  %v812_v47 = vmul.f32 %v1349_v0, %v808_v4  ;;  %v828_v57 = vadd.f32 %v820_v44, %v809_v31  ;;  %v2156_v0 = vld [vmem:[#allocation12_spill] sm:$0xff] }
  0xe7   : > { %v1353_v39 = vpop.eup %1352  ;;  %v813_v19 = vmul.f32 %v1351_v21, %v808_v4  ;;  %v829_v55 = vadd.f32 %v820_v44, %v810_v61  ;;  %v891_v27 = vrot.slane %v830_v59, %v882_v18  ;;  %v2158_v21 = vld [vmem:[#allocation13_spill] sm:$0xff] }
  0xe8   : > { %v1355_v1 = vpop.eup %1354  ;;  %v814_v46 = vmul.f32 %v1353_v39, %v808_v4  ;;  %v831_v56 = vadd.f32 %v821_v16, %v812_v47  ;;  %v883_v60 = vrot.slane %v828_v57, %v882_v18  ;;  %v2149_v16 = vld [vmem:[#allocation5_spill] sm:$0xff]  ;;  %v2159_v57 = vld [vmem:[#allocation16_spill] sm:$0xff] }
  0xe9   : > { %v1357_v45 = vpop.eup %1356  ;;  %v815_v26 = vmul.f32 %v1355_v1, %v808_v4  ;;  %v832_v40 = vadd.f32 %v822_v37, %v813_v19  ;;  %v887_v41 = vrot.slane %v829_v55, %v882_v18  ;;  %v920_v23 = vmul.f32 %v891_v27, %v1552_v15  ;;  %v2160_v19 = vld [vmem:[#allocation17_spill] sm:$0xff]  ;;  %v2161_v1 = vld [vmem:[#allocation28_spill] sm:$0xff] }
  0xea   : > { %v816_v35 = vmul.f32 %v1357_v45, %v808_v4  ;;  %v833_v22 = vadd.f32 %v822_v37, %v814_v46  ;;  %v895_v34 = vrot.slane %v831_v56, %v882_v18  ;;  %v912_v33 = vmul.f32 %v883_v60, %v1540_v11  ;;  %v2146_v4 = vld [vmem:[#allocation19_spill] sm:$0xff]  ;;  %v2162_v56 = vld [vmem:[#allocation29_spill] sm:$0xff] }
  0xeb   : > { %v834_v6 = vadd.f32 %v823_v24, %v815_v26  ;;  %v899_v9 = vrot.slane %v832_v40, %v882_v18  ;;  %v913_v58 = vmul.f32 %v887_v41, %v1546_v13  ;;  %v914_v44 = vmul.f32 %v883_v60, %v1543_v12  ;;  %v2152_v37 = vld [vmem:[#allocation15_spill] sm:$0xff]  ;;  %v2164_v26 = vld [vmem:[#allocation20_spill] sm:$0xff] }
  0xec   : > { %v835_v52 = vadd.f32 %v823_v24, %v816_v35  ;;  %v903_v63 = vrot.slane %v833_v22, %v882_v18  ;;  %v915_v28 = vmul.f32 %v887_v41, %v1549_v14  ;;  %v916_v5 = vmul.f32 %v883_v60, %v2133_v8  ;;  %v2153_v24 = vld [vmem:[#allocation24_spill] sm:$0xff]  ;;  %v2166_v22 = vld [vmem:[#allocation23_spill] sm:$0xff] }
  0xed   : > { %v907_v3 = vrot.slane %v834_v6, %v882_v18  ;;  %v917_v15 = vmul.f32 %v887_v41, %v2134_v10  ;;  %v918_v53 = vmul.f32 %v883_v60, %v2146_v4  ;;  %v919_v30 = vmul.f32 %v887_v41, %v2147_v38  ;;  %v2155_v10 = vld [vmem:[#allocation9_spill] sm:$0xff]  ;;  %v2165_v41 = vld [vmem:[#allocation22_spill] sm:$0xff] }
  0xee   : > { %v911_v11 = vrot.slane %v835_v52, %v882_v18  ;;  %v921_v62 = vmul.f32 %v895_v34, %v2148_v7  ;;  %v922_v13 = vmul.f32 %v891_v27, %v2149_v16  ;;  %v923_v12 = vmul.f32 %v895_v34, %v2150_v17  ;;  %v2157_v18 = vld [vmem:[#allocation10_spill] sm:$0xff]  ;;  %v2167_v6 = vld [vmem:[#allocation25_spill] sm:$0xff]  ;;  %v2169_v16 = vld [vmem:[#allocation31_spill] sm:$0xff] }
  0xef   : > { %v924_v20 = vmul.f32 %v891_v27, %v2151_v51  ;;  %v925_v14 = vmul.f32 %v895_v34, %v2152_v37  ;;  %v926_v8 = vmul.f32 %v891_v27, %v2153_v24  ;;  %v927_v43 = vmul.f32 %v895_v34, %v2154_v54  ;;  %v2163_v27 = vld [vmem:[#allocation18_spill] sm:$0xff] }
  0xf0   : > { %v928_v31 = vmul.f32 %v899_v9, %v2155_v10  ;;  %v929_v61 = vmul.f32 %v903_v63, %v2156_v0  ;;  %v930_v59 = vmul.f32 %v899_v9, %v2157_v18  ;;  %v931_v47 = vmul.f32 %v903_v63, %v2158_v21  ;;  %v2168_v38 = vld [vmem:[#allocation30_spill] sm:$0xff] }
  0xf1   : > { %v932_v39 = vmul.f32 %v899_v9, %v2159_v57  ;;  %v933_v55 = vmul.f32 %v903_v63, %v2160_v19  ;;  %v934_v46 = vmul.f32 %v899_v9, %v2161_v1  ;;  %v935_v60 = vmul.f32 %v903_v63, %v2162_v56 }
  0xf2   : > { %v936_v45 = vmul.f32 %v907_v3, %v2163_v27  ;;  %v937_v40 = vmul.f32 %v911_v11, %v2164_v26  ;;  %v938_v35 = vmul.f32 %v907_v3, %v2165_v41  ;;  %v939_v34 = vmul.f32 %v911_v11, %v2166_v22 }
  0xf3   : > { %v940_v52 = vmul.f32 %v907_v3, %v2167_v6  ;;  %v941_v4 = vmul.f32 %v911_v11, %v2140_v50  ;;  %v942_v7 = vmul.f32 %v907_v3, %v2168_v38  ;;  %v943_v17 = vmul.f32 %v911_v11, %v2169_v16 }
  0xf4   : > { %v944_v9 = vadd.f32 %v920_v23, %v912_v33  ;;  %v947_v1 = vadd.f32 %v921_v62, %v913_v58  ;;  %v950_v63 = vadd.f32 %v922_v13, %v914_v44  ;;  %v953_v56 = vadd.f32 %v923_v12, %v915_v28 }
  0xf5   : > { %v956_v27 = vadd.f32 %v924_v20, %v916_v5  ;;  %v959_v19 = vadd.f32 %v925_v14, %v917_v15  ;;  %v962_v26 = vadd.f32 %v926_v8, %v918_v53  ;;  %v965_v57 = vadd.f32 %v927_v43, %v919_v30 }
  0xf6   : > { %v945_v41 = vadd.f32 %v944_v9, %v928_v31  ;;  %v948_v21 = vadd.f32 %v947_v1, %v929_v61  ;;  %v951_v22 = vadd.f32 %v950_v63, %v930_v59  ;;  %v954_v18 = vadd.f32 %v953_v56, %v931_v47  ;;  %v1364_v9 = vld [vmem:[%s1537_s17 + $0x30] sm:$0xff] }
  0xf7   : > { %v957_v3 = vadd.f32 %v956_v27, %v932_v39  ;;  %v960_v38 = vadd.f32 %v959_v19, %v933_v55  ;;  %v963_v11 = vadd.f32 %v962_v26, %v934_v46  ;;  %v966_v16 = vadd.f32 %v965_v57, %v935_v60 }
  0xf8   : > { %v946_v23 = vadd.f32 %v945_v41, %v936_v45  ;;  %v949_v33 = vadd.f32 %v948_v21, %v937_v40  ;;  %v952_v58 = vadd.f32 %v951_v22, %v938_v35  ;;  %v955_v44 = vadd.f32 %v954_v18, %v939_v34  ;;  %v1358_v41 = vld [vmem:[%s1537_s17] sm:$0xff]  ;;  %v1359_v22 = vld [vmem:[%s1537_s17 + $0x8] sm:$0xff] }
  0xf9   : > { %v958_v28 = vadd.f32 %v957_v3, %v940_v52  ;;  %v961_v5 = vadd.f32 %v960_v38, %v941_v4  ;;  %v964_v15 = vadd.f32 %v963_v11, %v942_v7  ;;  %v967_v53 = vadd.f32 %v966_v16, %v943_v17  ;;  %v1360_v52 = vld [vmem:[%s1537_s17 + $0x10] sm:$0xff]  ;;  %v1361_v38 = vld [vmem:[%s1537_s17 + $0x18] sm:$0xff]  ;;  %v1362_v16 = vld [vmem:[%s1537_s17 + $0x20] sm:$0xff] }
  0xfa   : > { %968 = vst [vmem:[%s344_s23] sm:$0xff] %v946_v23  ;;  %969 = vst [vmem:[%s344_s23 + $0x8] sm:$0xff] %v949_v33  ;;  %v1008_v30 = vmul.f32 %v1846_v42, %v946_v23  ;;  %v1009_v62 = vmul.f32 %v1848_v49, %v949_v33  ;;  %v1010_v13 = vmul.f32 %v1846_v42, %v952_v58  ;;  %v1363_v17 = vld [vmem:[%s1537_s17 + $0x28] sm:$0xff]  ;;  %v1365_v3 = vld [vmem:[%s1537_s17 + $0x38] sm:$0xff] }
  0xfb   : > { %970 = vst [vmem:[%s344_s23 + $0x10] sm:$0xff] %v952_v58  ;;  %971 = vst [vmem:[%s344_s23 + $0x18] sm:$0xff] %v955_v44  ;;  %v1011_v12 = vmul.f32 %v1848_v49, %v955_v44  ;;  %v1012_v20 = vmul.f32 %v1846_v42, %v958_v28  ;;  %v1013_v14 = vmul.f32 %v1848_v49, %v961_v5 }
  0xfc   : > { %972 = vst [vmem:[%s344_s23 + $0x20] sm:$0xff] %v958_v28  ;;  %973 = vst [vmem:[%s344_s23 + $0x28] sm:$0xff] %v961_v5  ;;  %v1014_v8 = vmul.f32 %v1846_v42, %v964_v15  ;;  %v1015_v43 = vmul.f32 %v1848_v49, %v967_v53  ;;  %v1016_v31 = vmul.f32 %v1850_v48, %v946_v23 }
  0xfd   : > { %974 = vst [vmem:[%s344_s23 + $0x30] sm:$0xff] %v964_v15  ;;  %975 = vst [vmem:[%s344_s23 + $0x38] sm:$0xff] %v967_v53  ;;  %v1017_v61 = vmul.f32 %v1852_v25, %v949_v33  ;;  %v1018_v18 = vmul.f32 %v1850_v48, %v952_v58  ;;  %v1019_v59 = vmul.f32 %v1852_v25, %v955_v44 }
  0xfe   : > { %v1020_v21 = vmul.f32 %v1850_v48, %v958_v28  ;;  %v1021_v47 = vmul.f32 %v1852_v25, %v961_v5  ;;  %v1022_v57 = vmul.f32 %v1850_v48, %v964_v15  ;;  %v1023_v39 = vmul.f32 %v1852_v25, %v967_v53 }
  0xff   : > { %v1024_v42 = vmul.f32 %v1854_v36, %v946_v23  ;;  %v1025_v49 = vmul.f32 %v1856_v32, %v949_v33  ;;  %v1026_v19 = vmul.f32 %v1854_v36, %v952_v58  ;;  %v1027_v55 = vmul.f32 %v1856_v32, %v955_v44 }
 0x100   : > { %v1028_v1 = vmul.f32 %v1854_v36, %v958_v28  ;;  %v1029_v46 = vmul.f32 %v1856_v32, %v961_v5  ;;  %v1030_v56 = vmul.f32 %v1854_v36, %v964_v15  ;;  %v1031_v48 = vmul.f32 %v1856_v32, %v967_v53 }
 0x101   : > { %v1032_v25 = vmul.f32 %v1858_v29, %v946_v23  ;;  %v1033_v60 = vmul.f32 %v1860_v2, %v949_v33  ;;  %v1034_v27 = vmul.f32 %v1858_v29, %v952_v58  ;;  %v1035_v45 = vmul.f32 %v1860_v2, %v955_v44  ;;  %v1366_v23 = vld [vmem:[%s1537_s17 + $0x40] sm:$0xff]  ;;  %v1367_v58 = vld [vmem:[%s1537_s17 + $0x48] sm:$0xff] }
 0x102   : > { %v1934_v36 = vmul.f32 %v1858_v29, %v958_v28  ;;  %v1937_v32 = vmul.f32 %v1860_v2, %v961_v5  ;;  %v1940_v26 = vmul.f32 %v1858_v29, %v964_v15  ;;  %v1943_v40 = vmul.f32 %v1860_v2, %v967_v53  ;;  %v1368_v28 = vld [vmem:[%s1537_s17 + $0x50] sm:$0xff]  ;;  %v1369_v15 = vld [vmem:[%s1537_s17 + $0x58] sm:$0xff] }
 0x103   : > { %v1040_v35 = vadd.f32 %v1358_v41, %v1008_v30  ;;  %v1041_v34 = vadd.f32 %v1359_v22, %v1009_v62  ;;  %v1042_v4 = vadd.f32 %v1360_v52, %v1010_v13  ;;  %v1043_v7 = vadd.f32 %v1361_v38, %v1011_v12 }
 0x104   : > { %v1044_v29 = vadd.f32 %v1362_v16, %v1012_v20  ;;  %v1045_v2 = vadd.f32 %v1363_v17, %v1013_v14  ;;  %v1046_v63 = vadd.f32 %v1364_v9, %v1014_v8  ;;  %v1047_v11 = vadd.f32 %v1365_v3, %v1015_v43  ;;  %v2170_v8 = vld [vmem:[#allocation10_spill] sm:$0xff]  ;;  %v2171_v43 = vld [vmem:[#allocation13_spill] sm:$0xff] }
 0x105   : > { %v1048_v33 = vadd.f32 %v1366_v23, %v1016_v31  ;;  %v1049_v44 = vadd.f32 %v1367_v58, %v1017_v61  ;;  %v1050_v5 = vadd.f32 %v1368_v28, %v1018_v18  ;;  %v1051_v53 = vadd.f32 %v1369_v15, %v1019_v59  ;;  %1072 = vst [vmem:[%s1931_s30] sm:$0xff] %v1040_v35  ;;  %v2173_v31 = vld [vmem:[#allocation17_spill] sm:$0xff]  ;;  %v2174_v18 = vld [vmem:[#allocation28_spill] sm:$0xff] }
 0x106   : > { %1073 = vst [vmem:[%s1931_s30 + $0x8] sm:$0xff] %v1041_v34  ;;  %1074 = vst [vmem:[%s1931_s30 + $0x10] sm:$0xff] %v1042_v4  ;;  %v1052_v30 = vadd.f32 %v1020_v21, %v2151_v51  ;;  %v1053_v62 = vadd.f32 %v1021_v47, %v2152_v37  ;;  %v1054_v13 = vadd.f32 %v1022_v57, %v2153_v24  ;;  %v2172_v24 = vld [vmem:[#allocation16_spill] sm:$0xff]  ;;  %v2175_v59 = vld [vmem:[#allocation29_spill] sm:$0xff] }
 0x107   : > { %1075 = vst [vmem:[%s1931_s30 + $0x18] sm:$0xff] %v1043_v7  ;;  %v1055_v12 = vadd.f32 %v1023_v39, %v2154_v54  ;;  %1076 = vst [vmem:[%s1931_s30 + $0x20] sm:$0xff] %v1044_v29  ;;  %v1056_v20 = vadd.f32 %v1024_v42, %v2155_v10  ;;  %v1057_v14 = vadd.f32 %v1025_v49, %v2156_v0  ;;  %v2176_v21 = vld [vmem:[#allocation18_spill] sm:$0xff]  ;;  %v2177_v57 = vld [vmem:[#allocation20_spill] sm:$0xff] }
 0x108   : > { %1077 = vst [vmem:[%s1931_s30 + $0x28] sm:$0xff] %v1045_v2  ;;  %1078 = vst [vmem:[%s1931_s30 + $0x30] sm:$0xff] %v1046_v63  ;;  %v1058_v51 = vadd.f32 %v1026_v19, %v2170_v8  ;;  %v1059_v37 = vadd.f32 %v1027_v55, %v2171_v43  ;;  %v1060_v54 = vadd.f32 %v1028_v1, %v2172_v24  ;;  %v2178_v42 = vld [vmem:[#allocation22_spill] sm:$0xff]  ;;  %v2179_v19 = vld [vmem:[#allocation23_spill] sm:$0xff] }
 0x109   : > { %1079 = vst [vmem:[%s1931_s30 + $0x38] sm:$0xff] %v1047_v11  ;;  %1080 = vst [vmem:[%s1931_s30 + $0x40] sm:$0xff] %v1048_v33  ;;  %v1061_v61 = vadd.f32 %v1029_v46, %v2173_v31  ;;  %v1062_v10 = vadd.f32 %v1030_v56, %v2174_v18  ;;  %v1063_v0 = vadd.f32 %v1031_v48, %v2175_v59  ;;  %v2180_v56 = vld [vmem:[#allocation30_spill] sm:$0xff] }
 0x10a   : > { %1081 = vst [vmem:[%s1931_s30 + $0x48] sm:$0xff] %v1049_v44  ;;  %1082 = vst [vmem:[%s1931_s30 + $0x50] sm:$0xff] %v1050_v5  ;;  %v1064_v47 = vadd.f32 %v1032_v25, %v2176_v21  ;;  %v1065_v39 = vadd.f32 %v1033_v60, %v2177_v57  ;;  %v1066_v49 = vadd.f32 %v1034_v27, %v2178_v42  ;;  %v2181_v25 = vld [vmem:[#allocation31_spill] sm:$0xff] }
 0x10b   : > { %1083 = vst [vmem:[%s1931_s30 + $0x58] sm:$0xff] %v1051_v53  ;;  %1084 = vst [vmem:[%s1931_s30 + $0x60] sm:$0xff] %v1052_v30  ;;  %v1067_v55 = vadd.f32 %v1035_v45, %v2179_v19  ;;  %v1068_v1 = vadd.f32 %v1934_v36, %v2167_v6  ;;  %v1069_v46 = vadd.f32 %v1937_v32, %v2140_v50 }
 0x10c   : > { %1085 = vst [vmem:[%s1931_s30 + $0x68] sm:$0xff] %v1053_v62  ;;  %1086 = vst [vmem:[%s1931_s30 + $0x70] sm:$0xff] %v1054_v13  ;;  %v1070_v48 = vadd.f32 %v1940_v26, %v2180_v56  ;;  %v1071_v60 = vadd.f32 %v1943_v40, %v2181_v25 }
 0x10d   : > { %1087 = vst [vmem:[%s1931_s30 + $0x78] sm:$0xff] %v1055_v12  ;;  %1088 = vst [vmem:[%s1931_s30 + $0x80] sm:$0xff] %v1056_v20 }
 0x10e   : > { %1089 = vst [vmem:[%s1931_s30 + $0x88] sm:$0xff] %v1057_v14  ;;  %1090 = vst [vmem:[%s1931_s30 + $0x90] sm:$0xff] %v1058_v51 }
 0x10f   : > { %1091 = vst [vmem:[%s1931_s30 + $0x98] sm:$0xff] %v1059_v37  ;;  %1092 = vst [vmem:[%s1931_s30 + $0xa0] sm:$0xff] %v1060_v54 }
 0x110   : > { %1093 = vst [vmem:[%s1931_s30 + $0xa8] sm:$0xff] %v1061_v61  ;;  %1094 = vst [vmem:[%s1931_s30 + $0xb0] sm:$0xff] %v1062_v10 }
 0x111   : > { %1095 = vst [vmem:[%s1931_s30 + $0xb8] sm:$0xff] %v1063_v0  ;;  %1096 = vst [vmem:[%s1931_s30 + $0xc0] sm:$0xff] %v1064_v47 }
 0x112   : > { %1097 = vst [vmem:[%s1931_s30 + $0xc8] sm:$0xff] %v1065_v39  ;;  %1098 = vst [vmem:[%s1931_s30 + $0xd0] sm:$0xff] %v1066_v49 }
 0x113   : > { %1099 = vst [vmem:[%s1931_s30 + $0xd8] sm:$0xff] %v1067_v55  ;;  %1100 = vst [vmem:[%s1931_s30 + $0xe0] sm:$0xff] %v1068_v1 }
 0x114   : > { %1101 = vst [vmem:[%s1931_s30 + $0xe8] sm:$0xff] %v1069_v46  ;;  %1102 = vst [vmem:[%s1931_s30 + $0xf0] sm:$0xff] %v1070_v48 }
 0x115   : > { %1103 = vst [vmem:[%s1931_s30 + $0xf8] sm:$0xff] %v1071_v60 }
 0x116 PF: > { %s19_s26 = sadd.s32 1, %s1411_s26   ;;  %s2182_s24 = smov %s1407_s25 }
 0x117   : > { %p16_p2 = scmp.ge.s32.totalorder %s19_s26, 4   ;;  %s2183_s25 = smov %s2185_s28 }
 0x119   :  { %18 = sbr.rel (!%p16_p2) target bundleno = 2 (0x2), region = 91 }
 0x11e   :  { %1159 = vsyncpa [#allocation3], 1 }
 0x11f   :  { %1161 = vsyncpa [#allocation3 + $0x1], 1 }

</bundles_post_ra>
